<compile_context>
chip_gen: v7x
topology: tpu7x:2x2x1
jax: 0.10.0
libtpu: 0.0.40
codegen_flags: <defaults>
</compile_context>

<pallas_src>
import jax
import jax.numpy as jnp
from jax.experimental import pallas as pl
from jax.experimental.pallas import tpu as pltpu


def _round_up(x, m):
    return ((x + m - 1) // m) * m


def _cdiv(a, b):
    return (a + b - 1) // b


def _sublane_granule(dtype):
    # rows per packed sublane tile: f32 -> 8, bf16 -> 16, int8/fp8 -> 32
    return max(8, 32 // jnp.dtype(dtype).itemsize)


def _vmem_budget_bytes():
    """Generation-aware VMEM budget/limit (128 MiB parts vs v7x's 64 MiB/TC)."""
    cap = 128 * 1024 * 1024
    try:
        cap = int(pltpu.get_tpu_info().vmem_capacity_bytes)
    except Exception:  # no TPU info available at trace time; assume 128 MiB part
        pass
    budget = (cap * 3) // 4          # ~96 MiB on v5e/v6e, ~48 MiB on v7x
    limit_cap = cap - (16 << 20)     # leave headroom for compiler scratch
    return budget, limit_cap


def _choose_tile(m_rows, d_in, d_hidden, d_out, x_bytes, w_bytes, out_bytes,
                 row_granule, weight_bufs=2, tm_cap=1024):
    """Pick the token-row tile from the generation-aware VMEM budget."""
    budget, limit_cap = _vmem_budget_bytes()
    dims = (d_in,) + tuple(d_hidden) + (d_out,)
    w_elems = sum(a * b for a, b in zip(dims[:-1], dims[1:]))
    # weight_bufs=2 stays conservative so the non-Buffered(1) fallback also fits.
    wb = weight_bufs * w_bytes * w_elems
    bb = weight_bufs * 4 * sum(dims[1:])
    if wb + bb > budget:
        # TODO(synk): add a second grid axis tiling the hidden/output feature dim
        # (128/256-wide N blocks) when the weights alone exceed the per-core VMEM
        # budget (relevant for multi-K d_hidden on v7x), instead of failing here.
        raise ValueError("TokenCLSHead weights do not fit in the VMEM budget; "
                         "feature-dim tiling is not implemented.")
    # per-token-row VMEM: double-buffered x/out tiles + f32 intermediates
    # (+ their compute-dtype copies feeding the next matmul)
    per_row = (2 * d_in * x_bytes + 2 * d_out * out_bytes
               + (4 + w_bytes) * (sum(d_hidden) + d_out))
    tm = (budget - wb - bb) // per_row
    tm = min(tm, tm_cap)
    # keep >= 2 grid steps so both v7x TensorCores get work on the parallel axis
    tm = min(tm, _round_up(_cdiv(m_rows, 2), row_granule))
    tm = max(row_granule, (tm // row_granule) * row_granule)
    vmem_need = wb + bb + tm * per_row
    vmem_limit = int(min(limit_cap, max(vmem_need + (8 << 20), 32 << 20)))
    return int(tm), vmem_limit


def _make_mlp_head_kernel(n_hidden, compute_dtype):
    """Kernel refs: (x, w0, b0, ..., w_out, b_out, out)."""

    def kernel(*refs):
        x_ref, o_ref = refs[0], refs[-1]
        wb = refs[1:-1]
        # in-kernel cast of the activation tile: no extra HBM pad/cast pass
        h = x_ref[...].astype(compute_dtype)
        for li in range(n_hidden):
            w, b = wb[2 * li][...], wb[2 * li + 1][...]
            h = jnp.dot(h, w, preferred_element_type=jnp.float32)   # MXU, f32 acc
            h = jnp.maximum(h + b, 0.0).astype(compute_dtype)       # bias+ReLU in f32
        # TODO(synk): nn.Dropout is identity at inference; training-mode dropout
        # (pltpu.prng_seed + pltpu.prng_random_bits mask) is not implemented here.
        w, b = wb[-2][...], wb[-1][...]
        out = jnp.dot(h, w, preferred_element_type=jnp.float32) + b
        o_ref[...] = out.astype(o_ref.dtype)

    return kernel


def prepare_head_params(weights, biases, compute_dtype=jnp.bfloat16):
    """One-time (model-load) preparation of the static head parameters.

    weights[i]: (in_features, out_features); biases[i]: (out_features,).
    Returns a flat tuple (w0, b0, ..., w_last, b_last) with weights cast to the
    compute dtype and biases as f32 row vectors.
    """
    params = []
    for w, b in zip(weights, biases):
        params.append(w.astype(compute_dtype))
        params.append(b.astype(jnp.float32).reshape(1, -1))
    return tuple(params)


def token_cls_head(emb, params, *, tm=None):
    """emb: (B, L, d_model) -> (B, L, n_tokens).  params from prepare_head_params."""
    B, L, d_model = emb.shape
    weights = params[0::2]
    n_hidden = len(weights) - 1
    d_hidden = tuple(int(w.shape[1]) for w in weights[:-1])
    n_tokens = int(weights[-1].shape[1])
    compute_dtype = weights[0].dtype
    out_dtype = emb.dtype

    M = B * L
    x2d = emb.reshape(M, d_model)        # no pad / no cast; cast happens in-kernel

    x_bytes = jnp.dtype(emb.dtype).itemsize
    w_bytes = jnp.dtype(compute_dtype).itemsize
    out_bytes = jnp.dtype(out_dtype).itemsize
    row_granule = max(_sublane_granule(emb.dtype), _sublane_granule(out_dtype))

    auto_tm, vmem_limit = _choose_tile(M, d_model, d_hidden, n_tokens,
                                       x_bytes, w_bytes, out_bytes, row_granule)
    if tm is None:
        tm = auto_tm
    n_steps = _cdiv(M, tm)               # ragged last tile is masked by Pallas

    # CostEstimate from the real (unpadded) dims and the actual HBM traffic.
    dims = (d_model,) + d_hidden + (n_tokens,)
    mm_elems = sum(a * b for a, b in zip(dims[:-1], dims[1:]))
    flops = 2 * M * mm_elems
    bytes_accessed = (M * d_model * x_bytes + mm_elems * w_bytes
                      + 4 * sum(dims[1:]) + M * n_tokens * out_bytes)
    cost = pl.CostEstimate(flops=flops, transcendentals=0,
                           bytes_accessed=bytes_accessed)

    kernel = _make_mlp_head_kernel(n_hidden, compute_dtype)

    def build_call(weight_mode):
        def wspec(shape):
            if weight_mode is None:
                return pl.BlockSpec(shape, lambda i: (0, 0))
            return pl.BlockSpec(shape, lambda i: (0, 0), pipeline_mode=weight_mode)

        in_specs = [pl.BlockSpec((tm, d_model), lambda i: (i, 0))]   # token rows
        for w in weights:
            in_specs.append(wspec((int(w.shape[0]), int(w.shape[1]))))  # W (resident)
            in_specs.append(wspec((1, int(w.shape[1]))))                # b (resident)
        return pl.pallas_call(
            kernel,
            out_shape=jax.ShapeDtypeStruct((M, n_tokens), out_dtype),
            grid_spec=pltpu.PrefetchScalarGridSpec(
                num_scalar_prefetch=0,
                grid=(n_steps,),
                in_specs=in_specs,
                out_specs=pl.BlockSpec((tm, n_tokens), lambda i: (i, 0)),
            ),
            compiler_params=pltpu.CompilerParams(
                dimension_semantics=("parallel",),   # rows split across TCs (v7x)
                vmem_limit_bytes=vmem_limit),
            cost_estimate=cost,
        )

    args = (x2d,) + tuple(params)
    try:
        # Constant index_map => no pipelining needed: single-buffer the weights.
        out2d = build_call(pl.Buffered(1))(*args)
    except Exception:
        # Fallback if this jax build rejects Buffered(1) on resident blocks.
        out2d = build_call(None)(*args)

    return out2d.reshape(B, L, n_tokens)


def _trunc_normal(key, shape, std=0.02):
    # matches nn.init.trunc_normal_(mean=0, std=0.02, a=-2, b=2): with std=0.02
    # the +/-2 absolute cutoffs are ~100 sigma away, so a plain normal is exact
    # in practice for this deterministic synthetic init.
    return (std * jax.random.normal(key, shape)).astype(jnp.float32)


if __name__ == "__main__":
    # params: d_model=32, d_hidden=[64, 32], n_tokens=16, dropout=0.1 (inference)
    B, L = 2, 8
    d_model = 32
    d_hidden = (64, 32)
    n_tokens = 16

    key = jax.random.PRNGKey(0)
    k_emb, k_w1, k_w2, k_w3 = jax.random.split(key, 4)

    emb = jax.random.normal(k_emb, (B, L, d_model), dtype=jnp.float32)

    # nn.Linear weights stored as (in_features, out_features); biases zero (constant_ 0.0).
    w1 = _trunc_normal(k_w1, (d_model, d_hidden[0]))
    b1 = jnp.zeros((d_hidden[0],), jnp.float32)
    w2 = _trunc_normal(k_w2, (d_hidden[0], d_hidden[1]))
    b2 = jnp.zeros((d_hidden[1],), jnp.float32)
    w3 = _trunc_normal(k_w3, (d_hidden[1], n_tokens))
    b3 = jnp.zeros((n_tokens,), jnp.float32)

    weights = (w1, w2, w3)
    biases = (b1, b2, b3)

    # --- f32 compute path: exact check vs the pure-JAX reference ---------------
    params_f32 = prepare_head_params(weights, biases, compute_dtype=jnp.float32)
    out_f32 = jax.block_until_ready(token_cls_head(emb, params_f32))

    h = jnp.maximum(emb.reshape(-1, d_model) @ w1 + b1, 0.0)
    h = jnp.maximum(h @ w2 + b2, 0.0)
    ref_f32 = (h @ w3 + b3).reshape(B, L, n_tokens)
    assert out_f32.shape == (B, L, n_tokens)
    assert jnp.allclose(out_f32, ref_f32, atol=1e-5, rtol=1e-5)

    # --- bf16 compute path (default fast path): check vs a bf16-mirrored ref ---
    params_bf16 = prepare_head_params(weights, biases, compute_dtype=jnp.bfloat16)
    out_bf16 = jax.block_until_ready(token_cls_head(emb, params_bf16))

    def _c(a):
        return a.astype(jnp.bfloat16).astype(jnp.float32)

    hb = jnp.maximum(_c(emb.reshape(-1, d_model)) @ _c(w1) + b1, 0.0)
    hb = jnp.maximum(_c(hb) @ _c(w2) + b2, 0.0)
    ref_bf16 = (_c(hb) @ _c(w3) + b3).reshape(B, L, n_tokens)
    assert out_bf16.shape == (B, L, n_tokens)
    assert jnp.allclose(out_bf16, ref_bf16, atol=1e-4, rtol=1e-2)

    print("KERNEL_OK")
</pallas_src>

<mosaic_0001>
module attributes {stable_mosaic.version = 11 : i64} {
  func.func @kernel(%arg0: i32, %arg1: memref<8x32xf32, #tpu.memory_space<vmem>>, %arg2: memref<32x64xf32, #tpu.memory_space<vmem>>, %arg3: memref<1x64xf32, #tpu.memory_space<vmem>>, %arg4: memref<64x32xf32, #tpu.memory_space<vmem>>, %arg5: memref<1x32xf32, #tpu.memory_space<vmem>>, %arg6: memref<32x16xf32, #tpu.memory_space<vmem>>, %arg7: memref<1x16xf32, #tpu.memory_space<vmem>>, %arg8: memref<8x16xf32, #tpu.memory_space<vmem>>) attributes {dimension_semantics = [#tpu.dimension_semantics<parallel>], iteration_bounds = array<i64: 2>, scalar_prefetch = 0 : i64, scratch_operands = 0 : i64, tpu.core_type = #tpu.core_type<tc>, window_params = [{transform_indices = @transform_0, window_bounds = array<i64: 8, 32>}, {pipeline_mode = #tpu.pipeline_mode<synchronous>, transform_indices = @transform_1, window_bounds = array<i64: 32, 64>}, {pipeline_mode = #tpu.pipeline_mode<synchronous>, transform_indices = @transform_2, window_bounds = array<i64: 1, 64>}, {pipeline_mode = #tpu.pipeline_mode<synchronous>, transform_indices = @transform_3, window_bounds = array<i64: 64, 32>}, {pipeline_mode = #tpu.pipeline_mode<synchronous>, transform_indices = @transform_4, window_bounds = array<i64: 1, 32>}, {pipeline_mode = #tpu.pipeline_mode<synchronous>, transform_indices = @transform_5, window_bounds = array<i64: 32, 16>}, {pipeline_mode = #tpu.pipeline_mode<synchronous>, transform_indices = @transform_6, window_bounds = array<i64: 1, 16>}, {transform_indices = @transform_7, window_bounds = array<i64: 8, 16>}]} {
    %c0 = arith.constant 0 : index
    %c0_0 = arith.constant 0 : index
    %0 = vector.load %arg1[%c0, %c0_0] : memref<8x32xf32, #tpu.memory_space<vmem>>, vector<8x32xf32>
    %c0_1 = arith.constant 0 : index
    %c0_2 = arith.constant 0 : index
    %1 = vector.load %arg2[%c0_1, %c0_2] : memref<32x64xf32, #tpu.memory_space<vmem>>, vector<32x64xf32>
    %c0_3 = arith.constant 0 : index
    %c0_4 = arith.constant 0 : index
    %2 = vector.load %arg3[%c0_3, %c0_4] : memref<1x64xf32, #tpu.memory_space<vmem>>, vector<1x64xf32>
    %cst = arith.constant dense<0.000000e+00> : vector<8x64xf32>
    %3 = tpu.matmul %0, %1, %cst {dimension_numbers = #tpu.dot_dimension_numbers<[1], [0], [0], [1], [0, 0, 1, 1], [], []>} : vector<8x32xf32>, vector<32x64xf32>, vector<8x64xf32> -> vector<8x64xf32>
    %4 = vector.broadcast %2 : vector<1x64xf32> to vector<8x64xf32>
    %5 = arith.addf %3, %4 : vector<8x64xf32>
    %cst_5 = arith.constant 0.000000e+00 : f32
    %6 = vector.broadcast %cst_5 : f32 to vector<8x64xf32>
    %7 = arith.maximumf %5, %6 : vector<8x64xf32>
    %c0_6 = arith.constant 0 : index
    %c0_7 = arith.constant 0 : index
    %8 = vector.load %arg4[%c0_6, %c0_7] : memref<64x32xf32, #tpu.memory_space<vmem>>, vector<64x32xf32>
    %c0_8 = arith.constant 0 : index
    %c0_9 = arith.constant 0 : index
    %9 = vector.load %arg5[%c0_8, %c0_9] : memref<1x32xf32, #tpu.memory_space<vmem>>, vector<1x32xf32>
    %cst_10 = arith.constant dense<0.000000e+00> : vector<8x32xf32>
    %10 = tpu.matmul %7, %8, %cst_10 {dimension_numbers = #tpu.dot_dimension_numbers<[1], [0], [0], [1], [0, 0, 1, 1], [], []>} : vector<8x64xf32>, vector<64x32xf32>, vector<8x32xf32> -> vector<8x32xf32>
    %11 = vector.broadcast %9 : vector<1x32xf32> to vector<8x32xf32>
    %12 = arith.addf %10, %11 : vector<8x32xf32>
    %cst_11 = arith.constant 0.000000e+00 : f32
    %13 = vector.broadcast %cst_11 : f32 to vector<8x32xf32>
    %14 = arith.maximumf %12, %13 : vector<8x32xf32>
    %c0_12 = arith.constant 0 : index
    %c0_13 = arith.constant 0 : index
    %15 = vector.load %arg6[%c0_12, %c0_13] : memref<32x16xf32, #tpu.memory_space<vmem>>, vector<32x16xf32>
    %c0_14 = arith.constant 0 : index
    %c0_15 = arith.constant 0 : index
    %16 = vector.load %arg7[%c0_14, %c0_15] : memref<1x16xf32, #tpu.memory_space<vmem>>, vector<1x16xf32>
    %cst_16 = arith.constant dense<0.000000e+00> : vector<8x16xf32>
    %17 = tpu.matmul %14, %15, %cst_16 {dimension_numbers = #tpu.dot_dimension_numbers<[1], [0], [0], [1], [0, 0, 1, 1], [], []>} : vector<8x32xf32>, vector<32x16xf32>, vector<8x16xf32> -> vector<8x16xf32>
    %18 = vector.broadcast %16 : vector<1x16xf32> to vector<8x16xf32>
    %19 = arith.addf %17, %18 : vector<8x16xf32>
    %c0_17 = arith.constant 0 : index
    %c0_18 = arith.constant 0 : index
    %20 = vector.load %arg8[%c0_17, %c0_18] : memref<8x16xf32, #tpu.memory_space<vmem>>, vector<8x16xf32>
    tpu.vector_store %arg8[%c0_17, %c0_18], %19 {strides = array<i32>} : memref<8x16xf32, #tpu.memory_space<vmem>>, vector<8x16xf32>,
    return
  }
  func.func @transform_0(%arg0: i32) -> (i32, i32) {
    %c0_i32 = arith.constant 0 : i32
    %c0_i32_0 = arith.constant 0 : i32
    return %arg0, %c0_i32 : i32, i32
  }
  func.func @transform_1(%arg0: i32) -> (i32, i32) {
    %c0_i32 = arith.constant 0 : i32
    %c0_i32_0 = arith.constant 0 : i32
    %c0_i32_1 = arith.constant 0 : i32
    return %c0_i32, %c0_i32_0 : i32, i32
  }
  func.func @transform_2(%arg0: i32) -> (i32, i32) {
    %c0_i32 = arith.constant 0 : i32
    %c0_i32_0 = arith.constant 0 : i32
    %c0_i32_1 = arith.constant 0 : i32
    return %c0_i32, %c0_i32_0 : i32, i32
  }
  func.func @transform_3(%arg0: i32) -> (i32, i32) {
    %c0_i32 = arith.constant 0 : i32
    %c0_i32_0 = arith.constant 0 : i32
    %c0_i32_1 = arith.constant 0 : i32
    return %c0_i32, %c0_i32_0 : i32, i32
  }
  func.func @transform_4(%arg0: i32) -> (i32, i32) {
    %c0_i32 = arith.constant 0 : i32
    %c0_i32_0 = arith.constant 0 : i32
    %c0_i32_1 = arith.constant 0 : i32
    return %c0_i32, %c0_i32_0 : i32, i32
  }
  func.func @transform_5(%arg0: i32) -> (i32, i32) {
    %c0_i32 = arith.constant 0 : i32
    %c0_i32_0 = arith.constant 0 : i32
    %c0_i32_1 = arith.constant 0 : i32
    return %c0_i32, %c0_i32_0 : i32, i32
  }
  func.func @transform_6(%arg0: i32) -> (i32, i32) {
    %c0_i32 = arith.constant 0 : i32
    %c0_i32_0 = arith.constant 0 : i32
    %c0_i32_1 = arith.constant 0 : i32
    return %c0_i32, %c0_i32_0 : i32, i32
  }
  func.func @transform_7(%arg0: i32) -> (i32, i32) {
    %c0_i32 = arith.constant 0 : i32
    %c0_i32_0 = arith.constant 0 : i32
    return %arg0, %c0_i32 : i32, i32
  }
}

module attributes {stable_mosaic.version = 11 : i64} {
  func.func @kernel(%arg0: i32, %arg1: memref<8x32xf32, #tpu.memory_space<vmem>>, %arg2: memref<32x64xf32, #tpu.memory_space<vmem>>, %arg3: memref<1x64xf32, #tpu.memory_space<vmem>>, %arg4: memref<64x32xf32, #tpu.memory_space<vmem>>, %arg5: memref<1x32xf32, #tpu.memory_space<vmem>>, %arg6: memref<32x16xf32, #tpu.memory_space<vmem>>, %arg7: memref<1x16xf32, #tpu.memory_space<vmem>>, %arg8: memref<8x16xf32, #tpu.memory_space<vmem>>) attributes {dimension_semantics = [#tpu.dimension_semantics<parallel>], iteration_bounds = array<i64: 2>, scalar_prefetch = 0 : i64, scratch_operands = 0 : i64, tpu.core_type = #tpu.core_type<tc>, window_params = [{transform_indices = @transform_0, window_bounds = array<i64: 8, 32>}, {pipeline_mode = #tpu.pipeline_mode<synchronous>, transform_indices = @transform_1, window_bounds = array<i64: 32, 64>}, {pipeline_mode = #tpu.pipeline_mode<synchronous>, transform_indices = @transform_2, window_bounds = array<i64: 1, 64>}, {pipeline_mode = #tpu.pipeline_mode<synchronous>, transform_indices = @transform_3, window_bounds = array<i64: 64, 32>}, {pipeline_mode = #tpu.pipeline_mode<synchronous>, transform_indices = @transform_4, window_bounds = array<i64: 1, 32>}, {pipeline_mode = #tpu.pipeline_mode<synchronous>, transform_indices = @transform_5, window_bounds = array<i64: 32, 16>}, {pipeline_mode = #tpu.pipeline_mode<synchronous>, transform_indices = @transform_6, window_bounds = array<i64: 1, 16>}, {transform_indices = @transform_7, window_bounds = array<i64: 8, 16>}]} {
    %c0 = arith.constant 0 : index
    %c0_0 = arith.constant 0 : index
    %0 = vector.load %arg1[%c0, %c0_0] : memref<8x32xf32, #tpu.memory_space<vmem>>, vector<8x32xf32>
    %c0_1 = arith.constant 0 : index
    %c0_2 = arith.constant 0 : index
    %1 = vector.load %arg2[%c0_1, %c0_2] : memref<32x64xf32, #tpu.memory_space<vmem>>, vector<32x64xf32>
    %c0_3 = arith.constant 0 : index
    %c0_4 = arith.constant 0 : index
    %2 = vector.load %arg3[%c0_3, %c0_4] : memref<1x64xf32, #tpu.memory_space<vmem>>, vector<1x64xf32>
    %cst = arith.constant dense<0.000000e+00> : vector<8x64xf32>
    %3 = tpu.matmul %0, %1, %cst {dimension_numbers = #tpu.dot_dimension_numbers<[1], [0], [0], [1], [0, 0, 1, 1], [], []>} : vector<8x32xf32>, vector<32x64xf32>, vector<8x64xf32> -> vector<8x64xf32>
    %4 = vector.broadcast %2 : vector<1x64xf32> to vector<8x64xf32>
    %5 = arith.addf %3, %4 : vector<8x64xf32>
    %cst_5 = arith.constant 0.000000e+00 : f32
    %6 = vector.broadcast %cst_5 : f32 to vector<8x64xf32>
    %7 = arith.maximumf %5, %6 : vector<8x64xf32>
    %c0_6 = arith.constant 0 : index
    %c0_7 = arith.constant 0 : index
    %8 = vector.load %arg4[%c0_6, %c0_7] : memref<64x32xf32, #tpu.memory_space<vmem>>, vector<64x32xf32>
    %c0_8 = arith.constant 0 : index
    %c0_9 = arith.constant 0 : index
    %9 = vector.load %arg5[%c0_8, %c0_9] : memref<1x32xf32, #tpu.memory_space<vmem>>, vector<1x32xf32>
    %cst_10 = arith.constant dense<0.000000e+00> : vector<8x32xf32>
    %10 = tpu.matmul %7, %8, %cst_10 {dimension_numbers = #tpu.dot_dimension_numbers<[1], [0], [0], [1], [0, 0, 1, 1], [], []>} : vector<8x64xf32>, vector<64x32xf32>, vector<8x32xf32> -> vector<8x32xf32>
    %11 = vector.broadcast %9 : vector<1x32xf32> to vector<8x32xf32>
    %12 = arith.addf %10, %11 : vector<8x32xf32>
    %cst_11 = arith.constant 0.000000e+00 : f32
    %13 = vector.broadcast %cst_11 : f32 to vector<8x32xf32>
    %14 = arith.maximumf %12, %13 : vector<8x32xf32>
    %c0_12 = arith.constant 0 : index
    %c0_13 = arith.constant 0 : index
    %15 = vector.load %arg6[%c0_12, %c0_13] : memref<32x16xf32, #tpu.memory_space<vmem>>, vector<32x16xf32>
    %c0_14 = arith.constant 0 : index
    %c0_15 = arith.constant 0 : index
    %16 = vector.load %arg7[%c0_14, %c0_15] : memref<1x16xf32, #tpu.memory_space<vmem>>, vector<1x16xf32>
    %cst_16 = arith.constant dense<0.000000e+00> : vector<8x16xf32>
    %17 = tpu.matmul %14, %15, %cst_16 {dimension_numbers = #tpu.dot_dimension_numbers<[1], [0], [0], [1], [0, 0, 1, 1], [], []>} : vector<8x32xf32>, vector<32x16xf32>, vector<8x16xf32> -> vector<8x16xf32>
    %18 = vector.broadcast %16 : vector<1x16xf32> to vector<8x16xf32>
    %19 = arith.addf %17, %18 : vector<8x16xf32>
    %c0_17 = arith.constant 0 : index
    %c0_18 = arith.constant 0 : index
    %20 = vector.load %arg8[%c0_17, %c0_18] : memref<8x16xf32, #tpu.memory_space<vmem>>, vector<8x16xf32>
    tpu.vector_store %arg8[%c0_17, %c0_18], %19 {strides = array<i32>} : memref<8x16xf32, #tpu.memory_space<vmem>>, vector<8x16xf32>,
    return
  }
  func.func @transform_0(%arg0: i32) -> (i32, i32) {
    %c0_i32 = arith.constant 0 : i32
    %c0_i32_0 = arith.constant 0 : i32
    return %arg0, %c0_i32 : i32, i32
  }
  func.func @transform_1(%arg0: i32) -> (i32, i32) {
    %c0_i32 = arith.constant 0 : i32
    %c0_i32_0 = arith.constant 0 : i32
    %c0_i32_1 = arith.constant 0 : i32
    return %c0_i32, %c0_i32_0 : i32, i32
  }
  func.func @transform_2(%arg0: i32) -> (i32, i32) {
    %c0_i32 = arith.constant 0 : i32
    %c0_i32_0 = arith.constant 0 : i32
    %c0_i32_1 = arith.constant 0 : i32
    return %c0_i32, %c0_i32_0 : i32, i32
  }
  func.func @transform_3(%arg0: i32) -> (i32, i32) {
    %c0_i32 = arith.constant 0 : i32
    %c0_i32_0 = arith.constant 0 : i32
    %c0_i32_1 = arith.constant 0 : i32
    return %c0_i32, %c0_i32_0 : i32, i32
  }
  func.func @transform_4(%arg0: i32) -> (i32, i32) {
    %c0_i32 = arith.constant 0 : i32
    %c0_i32_0 = arith.constant 0 : i32
    %c0_i32_1 = arith.constant 0 : i32
    return %c0_i32, %c0_i32_0 : i32, i32
  }
  func.func @transform_5(%arg0: i32) -> (i32, i32) {
    %c0_i32 = arith.constant 0 : i32
    %c0_i32_0 = arith.constant 0 : i32
    %c0_i32_1 = arith.constant 0 : i32
    return %c0_i32, %c0_i32_0 : i32, i32
  }
  func.func @transform_6(%arg0: i32) -> (i32, i32) {
    %c0_i32 = arith.constant 0 : i32
    %c0_i32_0 = arith.constant 0 : i32
    %c0_i32_1 = arith.constant 0 : i32
    return %c0_i32, %c0_i32_0 : i32, i32
  }
  func.func @transform_7(%arg0: i32) -> (i32, i32) {
    %c0_i32 = arith.constant 0 : i32
    %c0_i32_0 = arith.constant 0 : i32
    return %arg0, %c0_i32 : i32, i32
  }
}

</mosaic_0001>

<bundles_post_ra>
// kernel: tpu_custom_call.1
= control target key start
LH: loop header
LB: loop body
LE: loop exit
PB: predicated region body
PF: predicated region fallthrough
CT: control target
= control target key end

     0   :  { %12 = vsyncpa [#allocation3], 0  ;;  %s1022_s0 = inlined_call_operand.vmem [shape: f32[16,32], index: 0, kind: input, shape index: {}]   ;;  %s1023_s1 = inlined_call_operand.vmem [shape: f32[32,64], index: 1, kind: input, shape index: {}]   ;;  %s1024_s2 = inlined_call_operand.vmem [shape: f32[1,64], index: 2, kind: input, shape index: {}]   ;;  %s1025_s3 = inlined_call_operand.vmem [shape: f32[64,32], index: 3, kind: input, shape index: {}]   ;;  %s1026_s4 = inlined_call_operand.vmem [shape: f32[1,32], index: 4, kind: input, shape index: {}]   ;;  %s1027_s5 = inlined_call_operand.vmem [shape: f32[32,16], index: 5, kind: input, shape index: {}]   ;;  %s1028_s6 = inlined_call_operand.vmem [shape: f32[1,16], index: 6, kind: input, shape index: {}]   ;;  %s1029_s7 = inlined_call_operand.hbm [shape: f32[16,16], index: 7, kind: output, shape index: {}]  }
   0x1   :  { %14 = vsyncpa [#allocation3 + $0x1], 0  ;;  %s860_s24 = smov 0   ;;  %s862_s25 = smov 0  }
   0x2   :  { %s864_s26 = smov 0   ;;  %s866_s27 = smov 0  }
   0x3 LB: > { %s881_s28 = sadd.s32 4294967295, %s814_s27   ;;  %s610_s29 = sadd.s32 4294967294, %s814_s27   ;;  %s814_s27 = sphi %s866_s27, %s1035_s27   ;;  %s810_s26 = sphi %s864_s26, %s1034_s26   ;;  %s806_s25 = sphi %s862_s25, %s1033_s25   ;;  %s802_s24 = sphi %s860_s24, %s1032_s24  }
   0x4   : > { %s885_s30 = sadd.s32 1, %s814_s27   ;;  %s179_s8 = sadd.s32 1, %s810_s26 }
   0x5   : > { %s176_s9 = ssub.s32 %s814_s27, %s885_s30  ;;  %p189_p0 = scmp.ne.s32.totalorder %s810_s26, %s806_s25 }
   0x6   : > { %p177_p1 = scmp.eq.s32.totalorder %s176_s9, 0  ;;  %p190_p2 = scmp.eq.s32.totalorder %s881_s28, 1 }
   0x7   : > { %p195_p3 = scmp.ne.s32.totalorder %s806_s25, %s802_s24  ;;  %p196_p4 = scmp.eq.s32.totalorder %s610_s29, 1 }
   0x8   : > { %s896_s10 = scalar_select %p177_p1, %s810_s26, %s179_s8  }
   0x9   : > { %p898_p5 = por %p190_p2, %p189_p0  ;;  %p902_p6 = por %p196_p4, %p195_p3 }
   0xa   : > { %p613_p7 = scmp.ge.s32.totalorder %s814_s27, 1  ;;  %p239_p8 = scmp.lt.s32.totalorder %s814_s27, 3 }
   0xc   : > { %p240_p9 = pnand %p613_p7, %p239_p8 }
   0xd   : > { %v275_v0 = vld [vmem:[%s1023_s1] sm:$0xff] (!%p240_p9)  ;;  %v276_v1 = vld [vmem:[%s1023_s1 + $0x8] sm:$0xff] (!%p240_p9)  ;;  %v277_v2 = vld [vmem:[%s1023_s1 + $0x10] sm:$0xff] (!%p240_p9)  ;;  %v816_v3 = vmov (!%p240_p9), 0.0|0.0   ;;  %vm817_vm0 = vmmov (!%p240_p9), 0   ;;  %v818_v6 = vmov (!%p240_p9), 0.0  }
   0xe   : > { %243 = sbr.rel (%p240_p9) target bundleno = 686 (0x2ae), region = 48  ;;  %686 = vmatprep.subr.bf16.mxu0 (!%p240_p9), %v816_v3  ;;  %v687_v4 = vpack.c.bf16 (!%p240_p9), %v276_v1, %v275_v0  ;;  %v278_v5 = vld [vmem:[%s1023_s1 + $0x18] sm:$0xff] (!%p240_p9)  ;;  %653 = vmatprep.mubr.msk.f32.mxu0 (!%p240_p9), %vm817_vm0, %v818_v6  ;;  %p270_p10 = scmp.lt.s32.totalorder (!%p240_p9), %s881_s28, 1  ;;  %v361_v7 = vld [vmem:[%s1025_s3] sm:$0xff] (!%p240_p9)  ;;  %v362_v8 = vld [vmem:[%s1025_s3 + $0x8] sm:$0xff] (!%p240_p9)  ;;  %vm286_vm1 = vcmask (!%p240_p9), 261120  }
   0xf   : > { %692 = vmatprep.subr.bf16.mxu1 (!%p240_p9), %v816_v3  ;;  %v693_v9 = vpack.c.bf16 (!%p240_p9), %v362_v8, %v361_v7  ;;  %v363_v10 = vld [vmem:[%s1025_s3 + $0x10] sm:$0xff] (!%p240_p9)  ;;  %v364_v11 = vld [vmem:[%s1025_s3 + $0x18] sm:$0xff] (!%p240_p9)  ;;  %672 = vmatprep.mubr.msk.f32.mxu1 (!%p240_p9), %vm817_vm0, %v818_v6  ;;  %v690_v12 = vpack.c.bf16 (!%p240_p9), %v278_v5, %v277_v2  ;;  %v365_v14 = vld [vmem:[%s1025_s3 + $0x20] sm:$0xff] (!%p240_p9)  ;;  %vm376_vm2 = vcmask (!%p240_p9), 523264   ;;  %s267_s9 = sand.u32 (!%p240_p9), 1, %s806_s25   ;;  %vm535_vm3 = vcmask (!%p240_p9), 130048  }
  0x10   : > { %688 = vmatpush3.bf16.msra.mxu0 (!%p240_p9), %v687_v4  ;;  %v696_v13 = vpack.c.bf16 (!%p240_p9), %v364_v11, %v363_v10  ;;  %v366_v15 = vld [vmem:[%s1025_s3 + $0x28] sm:$0xff] (!%p240_p9)  ;;  %v367_v18 = vld [vmem:[%s1025_s3 + $0x30] sm:$0xff] (!%p240_p9)  ;;  %v368_v19 = vld [vmem:[%s1025_s3 + $0x38] sm:$0xff] (!%p240_p9)  ;;  %s614_s13 = sshll.u32 (!%p240_p9), %s267_s9, 3  ;;  %s538_s22 = scalar_lea.sflag (!%p240_p9), [#allocation3], %s267_s9 }
  0x11   : > { %689 = vmatprep.subr.bf16.mxu0 (!%p240_p9), %v816_v3  ;;  %694 = vmatpush3.bf16.msra.mxu1 (!%p240_p9), %v693_v9  ;;  %v699_v17 = vpack.c.bf16 (!%p240_p9), %v366_v15, %v365_v14  ;;  %v702_v20 = vpack.c.bf16 (!%p240_p9), %v368_v19, %v367_v18  ;;  %v451_v21 = vld [vmem:[%s1027_s5] sm:$0xff] (!%p240_p9)  ;;  %v452_v22 = vld [vmem:[%s1027_s5 + $0x8] sm:$0xff] (!%p240_p9)  ;;  %v453_v29 = vld [vmem:[%s1027_s5 + $0x10] sm:$0xff] (!%p240_p9)  ;;  %s269_s17 = scalar_lea.vmem (!%p240_p9), [#allocation2], %s614_s13 }
  0x12   : > { %695 = vmatprep.subr.bf16.mxu1 (!%p240_p9), %v816_v3  ;;  %v705_v23 = vpack.c.bf16 (!%p240_p9), %v452_v22, %v451_v21  ;;  %v616_v24 = vld [vmem:[%s1024_s2] ss:$0 sm:$0xff] (!%p240_p9)  ;;  %v454_v30 = vld [vmem:[%s1027_s5 + $0x18] sm:$0xff] (!%p240_p9)  ;;  %s551_s18 = sshll.u32 (!%p240_p9), %s269_s17, 4  ;;  %s982_s18 = int_to_ptr.vmem [resolvable:$true] %s551_s18 }
  0x13   : > { %v708_v31 = vpack.c.bf16 (!%p240_p9), %v454_v30, %v453_v29  ;;  %v618_v32 = vld [vmem:[%s1026_s4] ss:$0 sm:$0xff] (!%p240_p9) }
  0x14   : > { %691 = vmatpush3.bf16.msra.mxu0 (!%p240_p9), %v690_v12  ;;  %v620_v37 = vld [vmem:[%s1028_s6] ss:$0 sm:$0xff] (!%p240_p9) }
  0x15   : > { %s271_s15 = scalar_select %p270_p10, %s881_s28, 1  ;;  %697 = vmatpush3.bf16.msra.mxu1 %v696_v13  ;;  %704 = vmatprep.subr.bf16.mxu0 %v816_v3 }
  0x16   : > { %698 = vmatprep.subr.bf16.mxu1 %v816_v3 }
  0x17   : > { %s615_s16 = sshll.u32 %s271_s15, 3 }
  0x18   : > { %s273_s23 = scalar_lea.vmem %s1022_s0, %s615_s16  ;;  %s623_s16 = sshll.u32 %s881_s28, 7 }
  0x19   : > { %v274_v16 = vld [vmem:[%s273_s23] sm:$0xff]  ;;  %700 = vmatpush3.bf16.msra.mxu1 %v699_v17  ;;  %s980_s21 = scalar_lea.hbm %s1029_s7, %s623_s16  ;;  %s752_s23 = scalar_lea.vmem %s982_s18, 128 }
  0x1a   : > { %654 = vmatmul.mubr.msk.f32.vlgmr.msra.gmra.mrb[0].mxu0 %vm286_vm1, %v274_v16  ;;  %701 = vmatprep.subr.bf16.mxu1 %v816_v3  ;;  %p753_p11 = scmp.ne.s32.totalorder %s982_s18, %s752_s23  ;;  %s819_s28 = smov [#allocation2]  }
  0x1b   : > { %683 = vmatprep.mubr.msk.f32.mxu0 %vm817_vm0, %v818_v6  ;;  %706 = vmatpush3.bf16.msra.mxu0 %v705_v23  ;;  %s756_s29 = sshll.u32 %s819_s28, 4  ;;  %s757_s29 = int_to_ptr.vmem [resolvable:$false] %s756_s29 }
  0x1c   : > { %707 = vmatprep.subr.bf16.mxu0 %v816_v3  ;;  %p754_p12 = pnand %p753_p11, %p898_p5  ;;  %s758_s8 = scalar_lea.vmem %s757_s29, 256 }
  0x1d   : > { %703 = vmatpush3.bf16.msra.mxu1 %v702_v20  ;;  %p759_p0 = scmp.lt.s32.totalorder %s982_s18, %s757_s29  ;;  %p760_p1 = scmp.lt.s32.totalorder %s758_s8, %s752_s23 }
  0x1e   : > { %p755_p13 = pneg %p754_p12 }
  0x1f   : > { %709 = vmatpush3.bf16.msra.mxu0 %v708_v31  ;;  %p761_p2 = por %p760_p1, %p759_p0 }
  0x21   : > { %p762_p3 = pnand %p761_p2, %p755_p13 }
  0xed   : > { %v356_v25 = vpop.f32.mrb[0].mxu0 }
  0xee   : > { %v357_v26 = vadd.f32 %v616_v24, %v356_v25  ;;  %v655_v27 = vpop.f32.mrb[1].mxu0 }
  0xf0   : > { %v360_v28 = vmax.f32 %v357_v26, 0.0 }
  0xf2   : > { %673 = vmatmul.mubr.msk.f32.vlgmr.msra.gmra.mrb[0].mxu1 %vm376_vm2, %v360_v28 }
 0x1c5   : > { %v446_v33 = vpop.f32.mrb[0].mxu1 }
 0x1c6   : > { %v447_v34 = vadd.f32 %v618_v32, %v446_v33  ;;  %v674_v35 = vpop.f32.mrb[1].mxu1 }
 0x1c8   : > { %v450_v36 = vmax.f32 %v447_v34, 0.0 }
 0x1ca   : > { %684 = vmatmul.mubr.msk.f32.vlgmr.msra.gmra.mrb[2].mxu0 %vm286_vm1, %v450_v36 }
 0x29d   : > { %v531_v38 = vpop.f32.mrb[2].mxu0 }
 0x29e   : > { %v532_v39 = vadd.f32 %v620_v37, %v531_v38  ;;  %v685_v40 = vpop.f32.mrb[3].mxu0 }
 0x2a0   : > { %536 = vst.msk [vmem:[%s269_s17] sm:$0xff] %vm535_vm3, %v532_v39 }
 0x2a1   : > { %765 = shalt.err (!%p762_p3)
}
 0x2a2   : > { %s766_s9 = scalar_lea.hbm %s980_s21, 128  ;;  %s770_s15 = scalar_lea.hbm %s1029_s7, 256 }
 0x2a3   : > { %p767_p4 = scmp.ne.s32.totalorder %s980_s21, %s766_s9  ;;  %p771_p9 = scmp.lt.u32.totalorder %s980_s21, %s1029_s7 }
 0x2a4   : > { %p772_p10 = scmp.lt.u32.totalorder %s770_s15, %s766_s9  ;;  %p774_p12 = scmp.lt.u32.totalorder %s766_s9, %s980_s21 }
 0x2a5   : > { %p768_p7 = pnand %p767_p4, %p898_p5 }
 0x2a6   : > { %p773_p11 = por %p772_p10, %p771_p9 }
 0x2a7   : > { %p769_p8 = pneg %p768_p7 }
 0x2a8   : > { %p775_p13 = por %p774_p12, %p773_p11 }
 0x2aa   : > { %p776_p0 = pnand %p775_p13, %p769_p8 }
 0x2ac   : > { %779 = shalt.err (!%p776_p0)
}
 0x2ad   : > { %710 = dma.vmem_to_hbm [thread:$0]  (%p898_p5), %s982_s18, 128, %s980_s21, %s538_s22  }
 0x2ae PF: > { %p716_p1 = scmp.ge.s32.totalorder %s814_s27, 2  ;;  %s563_s19 = sand.u32 1, %s802_s24  }
 0x2af   : > { %s564_s20 = scalar_lea.sflag [#allocation3], %s563_s19 }
 0x2b0   : > { %p713_p2 = pnand %p716_p1, %p902_p6 }
 0x2b2   : > { %797 = dma.done.wait (!%p713_p2), %s564_s20, 128  }
 0x2b3   : > { %799 = vsyncadd (!%p713_p2), %s564_s20, 4294967168  ;;  %p17_p3 = scmp.ge.s32.totalorder %s885_s30, 4   ;;  %s1032_s24 = smov %s806_s25 }
 0x2b4   : > { %s1033_s25 = smov %s810_s26  ;;  %s1034_s26 = smov %s896_s10 }
 0x2b5   : > { %s1035_s27 = smov %s885_s30  ;;  %19 = sbr.rel (!%p17_p3) target bundleno = 3 (0x3), region = 83 }
 0x2bc   :  { %569 = vsyncpa [#allocation3], 1 }
 0x2bd   :  { %571 = vsyncpa [#allocation3 + $0x1], 1 }

// kernel: tpu_custom_call.1
= control target key start
LH: loop header
LB: loop body
LE: loop exit
PB: predicated region body
PF: predicated region fallthrough
CT: control target
= control target key end

     0   :  { %12 = vsyncpa [#allocation3], 0  ;;  %s1022_s0 = inlined_call_operand.vmem [shape: f32[16,32], index: 0, kind: input, shape index: {}]   ;;  %s1023_s1 = inlined_call_operand.vmem [shape: f32[32,64], index: 1, kind: input, shape index: {}]   ;;  %s1024_s2 = inlined_call_operand.vmem [shape: f32[1,64], index: 2, kind: input, shape index: {}]   ;;  %s1025_s3 = inlined_call_operand.vmem [shape: f32[64,32], index: 3, kind: input, shape index: {}]   ;;  %s1026_s4 = inlined_call_operand.vmem [shape: f32[1,32], index: 4, kind: input, shape index: {}]   ;;  %s1027_s5 = inlined_call_operand.vmem [shape: f32[32,16], index: 5, kind: input, shape index: {}]   ;;  %s1028_s6 = inlined_call_operand.vmem [shape: f32[1,16], index: 6, kind: input, shape index: {}]   ;;  %s1029_s7 = inlined_call_operand.hbm [shape: f32[16,16], index: 7, kind: output, shape index: {}]  }
   0x1   :  { %14 = vsyncpa [#allocation3 + $0x1], 0  ;;  %s860_s24 = smov 0   ;;  %s862_s25 = smov 0  }
   0x2   :  { %s864_s26 = smov 0   ;;  %s866_s27 = smov 0  }
   0x3 LB: > { %s881_s28 = sadd.s32 4294967295, %s814_s27   ;;  %s610_s29 = sadd.s32 4294967294, %s814_s27   ;;  %s814_s27 = sphi %s866_s27, %s1035_s27   ;;  %s810_s26 = sphi %s864_s26, %s1034_s26   ;;  %s806_s25 = sphi %s862_s25, %s1033_s25   ;;  %s802_s24 = sphi %s860_s24, %s1032_s24  }
   0x4   : > { %s885_s30 = sadd.s32 1, %s814_s27   ;;  %s179_s8 = sadd.s32 1, %s810_s26 }
   0x5   : > { %s176_s9 = ssub.s32 %s814_s27, %s885_s30  ;;  %p189_p0 = scmp.ne.s32.totalorder %s810_s26, %s806_s25 }
   0x6   : > { %p177_p1 = scmp.eq.s32.totalorder %s176_s9, 0  ;;  %p190_p2 = scmp.eq.s32.totalorder %s881_s28, 1 }
   0x7   : > { %p195_p3 = scmp.ne.s32.totalorder %s806_s25, %s802_s24  ;;  %p196_p4 = scmp.eq.s32.totalorder %s610_s29, 1 }
   0x8   : > { %s896_s10 = scalar_select %p177_p1, %s810_s26, %s179_s8  }
   0x9   : > { %p898_p5 = por %p190_p2, %p189_p0  ;;  %p902_p6 = por %p196_p4, %p195_p3 }
   0xa   : > { %p613_p7 = scmp.ge.s32.totalorder %s814_s27, 1  ;;  %p239_p8 = scmp.lt.s32.totalorder %s814_s27, 3 }
   0xc   : > { %p240_p9 = pnand %p613_p7, %p239_p8 }
   0xd   : > { %v275_v0 = vld [vmem:[%s1023_s1] sm:$0xff] (!%p240_p9)  ;;  %v276_v1 = vld [vmem:[%s1023_s1 + $0x8] sm:$0xff] (!%p240_p9)  ;;  %v277_v2 = vld [vmem:[%s1023_s1 + $0x10] sm:$0xff] (!%p240_p9)  ;;  %v816_v3 = vmov (!%p240_p9), 0.0|0.0   ;;  %vm817_vm0 = vmmov (!%p240_p9), 0   ;;  %v818_v6 = vmov (!%p240_p9), 0.0  }
   0xe   : > { %243 = sbr.rel (%p240_p9) target bundleno = 686 (0x2ae), region = 48  ;;  %686 = vmatprep.subr.bf16.mxu0 (!%p240_p9), %v816_v3  ;;  %v687_v4 = vpack.c.bf16 (!%p240_p9), %v276_v1, %v275_v0  ;;  %v278_v5 = vld [vmem:[%s1023_s1 + $0x18] sm:$0xff] (!%p240_p9)  ;;  %653 = vmatprep.mubr.msk.f32.mxu0 (!%p240_p9), %vm817_vm0, %v818_v6  ;;  %p270_p10 = scmp.lt.s32.totalorder (!%p240_p9), %s881_s28, 1  ;;  %v361_v7 = vld [vmem:[%s1025_s3] sm:$0xff] (!%p240_p9)  ;;  %v362_v8 = vld [vmem:[%s1025_s3 + $0x8] sm:$0xff] (!%p240_p9)  ;;  %vm286_vm1 = vcmask (!%p240_p9), 261120  }
   0xf   : > { %692 = vmatprep.subr.bf16.mxu1 (!%p240_p9), %v816_v3  ;;  %v693_v9 = vpack.c.bf16 (!%p240_p9), %v362_v8, %v361_v7  ;;  %v363_v10 = vld [vmem:[%s1025_s3 + $0x10] sm:$0xff] (!%p240_p9)  ;;  %v364_v11 = vld [vmem:[%s1025_s3 + $0x18] sm:$0xff] (!%p240_p9)  ;;  %672 = vmatprep.mubr.msk.f32.mxu1 (!%p240_p9), %vm817_vm0, %v818_v6  ;;  %v690_v12 = vpack.c.bf16 (!%p240_p9), %v278_v5, %v277_v2  ;;  %v365_v14 = vld [vmem:[%s1025_s3 + $0x20] sm:$0xff] (!%p240_p9)  ;;  %vm376_vm2 = vcmask (!%p240_p9), 523264   ;;  %s267_s9 = sand.u32 (!%p240_p9), 1, %s806_s25   ;;  %vm535_vm3 = vcmask (!%p240_p9), 130048  }
  0x10   : > { %688 = vmatpush3.bf16.msra.mxu0 (!%p240_p9), %v687_v4  ;;  %v696_v13 = vpack.c.bf16 (!%p240_p9), %v364_v11, %v363_v10  ;;  %v366_v15 = vld [vmem:[%s1025_s3 + $0x28] sm:$0xff] (!%p240_p9)  ;;  %v367_v18 = vld [vmem:[%s1025_s3 + $0x30] sm:$0xff] (!%p240_p9)  ;;  %v368_v19 = vld [vmem:[%s1025_s3 + $0x38] sm:$0xff] (!%p240_p9)  ;;  %s614_s13 = sshll.u32 (!%p240_p9), %s267_s9, 3  ;;  %s538_s22 = scalar_lea.sflag (!%p240_p9), [#allocation3], %s267_s9 }
  0x11   : > { %689 = vmatprep.subr.bf16.mxu0 (!%p240_p9), %v816_v3  ;;  %694 = vmatpush3.bf16.msra.mxu1 (!%p240_p9), %v693_v9  ;;  %v699_v17 = vpack.c.bf16 (!%p240_p9), %v366_v15, %v365_v14  ;;  %v702_v20 = vpack.c.bf16 (!%p240_p9), %v368_v19, %v367_v18  ;;  %v451_v21 = vld [vmem:[%s1027_s5] sm:$0xff] (!%p240_p9)  ;;  %v452_v22 = vld [vmem:[%s1027_s5 + $0x8] sm:$0xff] (!%p240_p9)  ;;  %v453_v29 = vld [vmem:[%s1027_s5 + $0x10] sm:$0xff] (!%p240_p9)  ;;  %s269_s17 = scalar_lea.vmem (!%p240_p9), [#allocation2], %s614_s13 }
  0x12   : > { %695 = vmatprep.subr.bf16.mxu1 (!%p240_p9), %v816_v3  ;;  %v705_v23 = vpack.c.bf16 (!%p240_p9), %v452_v22, %v451_v21  ;;  %v616_v24 = vld [vmem:[%s1024_s2] ss:$0 sm:$0xff] (!%p240_p9)  ;;  %v454_v30 = vld [vmem:[%s1027_s5 + $0x18] sm:$0xff] (!%p240_p9)  ;;  %s551_s18 = sshll.u32 (!%p240_p9), %s269_s17, 4  ;;  %s982_s18 = int_to_ptr.vmem [resolvable:$true] %s551_s18 }
  0x13   : > { %v708_v31 = vpack.c.bf16 (!%p240_p9), %v454_v30, %v453_v29  ;;  %v618_v32 = vld [vmem:[%s1026_s4] ss:$0 sm:$0xff] (!%p240_p9) }
  0x14   : > { %691 = vmatpush3.bf16.msra.mxu0 (!%p240_p9), %v690_v12  ;;  %v620_v37 = vld [vmem:[%s1028_s6] ss:$0 sm:$0xff] (!%p240_p9) }
  0x15   : > { %s271_s15 = scalar_select %p270_p10, %s881_s28, 1  ;;  %697 = vmatpush3.bf16.msra.mxu1 %v696_v13  ;;  %704 = vmatprep.subr.bf16.mxu0 %v816_v3 }
  0x16   : > { %698 = vmatprep.subr.bf16.mxu1 %v816_v3 }
  0x17   : > { %s615_s16 = sshll.u32 %s271_s15, 3 }
  0x18   : > { %s273_s23 = scalar_lea.vmem %s1022_s0, %s615_s16  ;;  %s623_s16 = sshll.u32 %s881_s28, 7 }
  0x19   : > { %v274_v16 = vld [vmem:[%s273_s23] sm:$0xff]  ;;  %700 = vmatpush3.bf16.msra.mxu1 %v699_v17  ;;  %s980_s21 = scalar_lea.hbm %s1029_s7, %s623_s16  ;;  %s752_s23 = scalar_lea.vmem %s982_s18, 128 }
  0x1a   : > { %654 = vmatmul.mubr.msk.f32.vlgmr.msra.gmra.mrb[0].mxu0 %vm286_vm1, %v274_v16  ;;  %701 = vmatprep.subr.bf16.mxu1 %v816_v3  ;;  %p753_p11 = scmp.ne.s32.totalorder %s982_s18, %s752_s23  ;;  %s819_s28 = smov [#allocation2]  }
  0x1b   : > { %683 = vmatprep.mubr.msk.f32.mxu0 %vm817_vm0, %v818_v6  ;;  %706 = vmatpush3.bf16.msra.mxu0 %v705_v23  ;;  %s756_s29 = sshll.u32 %s819_s28, 4  ;;  %s757_s29 = int_to_ptr.vmem [resolvable:$false] %s756_s29 }
  0x1c   : > { %707 = vmatprep.subr.bf16.mxu0 %v816_v3  ;;  %p754_p12 = pnand %p753_p11, %p898_p5  ;;  %s758_s8 = scalar_lea.vmem %s757_s29, 256 }
  0x1d   : > { %703 = vmatpush3.bf16.msra.mxu1 %v702_v20  ;;  %p759_p0 = scmp.lt.s32.totalorder %s982_s18, %s757_s29  ;;  %p760_p1 = scmp.lt.s32.totalorder %s758_s8, %s752_s23 }
  0x1e   : > { %p755_p13 = pneg %p754_p12 }
  0x1f   : > { %709 = vmatpush3.bf16.msra.mxu0 %v708_v31  ;;  %p761_p2 = por %p760_p1, %p759_p0 }
  0x21   : > { %p762_p3 = pnand %p761_p2, %p755_p13 }
  0xed   : > { %v356_v25 = vpop.f32.mrb[0].mxu0 }
  0xee   : > { %v357_v26 = vadd.f32 %v616_v24, %v356_v25  ;;  %v655_v27 = vpop.f32.mrb[1].mxu0 }
  0xf0   : > { %v360_v28 = vmax.f32 %v357_v26, 0.0 }
  0xf2   : > { %673 = vmatmul.mubr.msk.f32.vlgmr.msra.gmra.mrb[0].mxu1 %vm376_vm2, %v360_v28 }
 0x1c5   : > { %v446_v33 = vpop.f32.mrb[0].mxu1 }
 0x1c6   : > { %v447_v34 = vadd.f32 %v618_v32, %v446_v33  ;;  %v674_v35 = vpop.f32.mrb[1].mxu1 }
 0x1c8   : > { %v450_v36 = vmax.f32 %v447_v34, 0.0 }
 0x1ca   : > { %684 = vmatmul.mubr.msk.f32.vlgmr.msra.gmra.mrb[2].mxu0 %vm286_vm1, %v450_v36 }
 0x29d   : > { %v531_v38 = vpop.f32.mrb[2].mxu0 }
 0x29e   : > { %v532_v39 = vadd.f32 %v620_v37, %v531_v38  ;;  %v685_v40 = vpop.f32.mrb[3].mxu0 }
 0x2a0   : > { %536 = vst.msk [vmem:[%s269_s17] sm:$0xff] %vm535_vm3, %v532_v39 }
 0x2a1   : > { %765 = shalt.err (!%p762_p3)
}
 0x2a2   : > { %s766_s9 = scalar_lea.hbm %s980_s21, 128  ;;  %s770_s15 = scalar_lea.hbm %s1029_s7, 256 }
 0x2a3   : > { %p767_p4 = scmp.ne.s32.totalorder %s980_s21, %s766_s9  ;;  %p771_p9 = scmp.lt.u32.totalorder %s980_s21, %s1029_s7 }
 0x2a4   : > { %p772_p10 = scmp.lt.u32.totalorder %s770_s15, %s766_s9  ;;  %p774_p12 = scmp.lt.u32.totalorder %s766_s9, %s980_s21 }
 0x2a5   : > { %p768_p7 = pnand %p767_p4, %p898_p5 }
 0x2a6   : > { %p773_p11 = por %p772_p10, %p771_p9 }
 0x2a7   : > { %p769_p8 = pneg %p768_p7 }
 0x2a8   : > { %p775_p13 = por %p774_p12, %p773_p11 }
 0x2aa   : > { %p776_p0 = pnand %p775_p13, %p769_p8 }
 0x2ac   : > { %779 = shalt.err (!%p776_p0)
}
 0x2ad   : > { %710 = dma.vmem_to_hbm [thread:$0]  (%p898_p5), %s982_s18, 128, %s980_s21, %s538_s22  }
 0x2ae PF: > { %p716_p1 = scmp.ge.s32.totalorder %s814_s27, 2  ;;  %s563_s19 = sand.u32 1, %s802_s24  }
 0x2af   : > { %s564_s20 = scalar_lea.sflag [#allocation3], %s563_s19 }
 0x2b0   : > { %p713_p2 = pnand %p716_p1, %p902_p6 }
 0x2b2   : > { %797 = dma.done.wait (!%p713_p2), %s564_s20, 128  }
 0x2b3   : > { %799 = vsyncadd (!%p713_p2), %s564_s20, 4294967168  ;;  %p17_p3 = scmp.ge.s32.totalorder %s885_s30, 4   ;;  %s1032_s24 = smov %s806_s25 }
 0x2b4   : > { %s1033_s25 = smov %s810_s26  ;;  %s1034_s26 = smov %s896_s10 }
 0x2b5   : > { %s1035_s27 = smov %s885_s30  ;;  %19 = sbr.rel (!%p17_p3) target bundleno = 3 (0x3), region = 83 }
 0x2bc   :  { %569 = vsyncpa [#allocation3], 1 }
 0x2bd   :  { %571 = vsyncpa [#allocation3 + $0x1], 1 }

</bundles_post_ra>
